<compile_context>
chip_gen: v5e
topology: v5e:2x2
jax: 0.10.0
libtpu: 0.0.40
codegen_flags: <defaults>
</compile_context>

<pallas_src>
import math

import jax
import jax.numpy as jnp
import numpy as np
from jax.experimental import pallas as pl
from jax.experimental.pallas import tpu as pltpu

# ---- small BERT config ----
BATCH = 2
SEQ = 8
HIDDEN = 32
NUM_HEADS = 4
HEAD_DIM = HIDDEN // NUM_HEADS
LN_EPS = 1e-12


def bert_attention_kernel(x_ref, mask_ref, wqkv_ref, bqkv_ref, wo_ref, bo_ref,
                          gamma_ref, beta_ref, out_ref, probs_ref):
    """One batch element per grid step.

    x_ref:     (1, S, H)    hidden states for this batch element
    mask_ref:  (1, 1, S)    additive key mask (0 / -10000)
    wqkv_ref:  (H, 3H)      fused [Wq | Wk | Wv] (y = x @ W layout)
    bqkv_ref:  (1, 3H)      fused [bq | bk | bv]
    wo_ref:    (H, H)       output projection
    bo_ref / gamma_ref / beta_ref: (1, H)
    out_ref:   (1, S, H)    attention_output
    probs_ref: (1, nH, S, S) pre-dropout softmax (reference layout)
    """
    nH, hd = NUM_HEADS, HEAD_DIM
    x = x_ref[0]                                              # (S, H)
    seq_len, hidden = x.shape

    # --- fused QKV projection: one full-width MXU matmul ---
    qkv = jnp.dot(x, wqkv_ref[...],
                  preferred_element_type=jnp.float32) + bqkv_ref[...]   # (S, 3H)

    def split_heads(base):
        # static lane slices -> (nH, S, hd); relayout only, no extra MXU work
        return jnp.stack(
            [qkv[:, base + h * hd: base + (h + 1) * hd] for h in range(nH)],
            axis=0)

    q = split_heads(0)                                        # (nH, S, hd)
    k = split_heads(hidden)
    v = split_heads(2 * hidden)

    # --- attention scores for all heads at once ---
    scale = 1.0 / math.sqrt(HEAD_DIM)
    scores = jnp.einsum('hqd,hkd->hqk', q, k,
                        preferred_element_type=jnp.float32) * scale     # (nH, S, S)
    scores = scores + mask_ref[...]                            # (1,1,S) broadcasts over keys

    # --- softmax(dim=-1) with reciprocal-multiply (exact, f32 tolerances) ---
    m = jnp.max(scores, axis=-1, keepdims=True)
    e = jnp.exp(scores - m)
    denom = jnp.sum(e, axis=-1, keepdims=True)
    probs = e * pl.reciprocal(denom, approx=False)

    probs_ref[0] = probs                                      # (nH, S, S), reference layout

    # --- context, then fused full-K output projection ---
    ctx = jnp.einsum('hqk,hkd->hqd', probs, v,
                     preferred_element_type=jnp.float32)      # (nH, S, hd)
    ctx2d = jnp.concatenate([ctx[h] for h in range(nH)], axis=1)  # (S, H), head-major cols
    dense = jnp.dot(ctx2d, wo_ref[...],
                    preferred_element_type=jnp.float32) + bo_ref[...]

    # --- residual + LayerNorm (rsqrt on the EUP) ---
    resid = dense + x
    mu = jnp.mean(resid, axis=-1, keepdims=True)
    var = jnp.mean((resid - mu) ** 2, axis=-1, keepdims=True)
    normed = (resid - mu) * jax.lax.rsqrt(var + LN_EPS)
    out_ref[0] = normed * gamma_ref[...] + beta_ref[...]


def bert_attention(x, mask, params):
    """x: (B, S, H) f32.  mask: (B, 1, S) additive attention mask (0 / -10000)."""
    B, S, H = x.shape
    nH = NUM_HEADS

    # Wrapper-side weight fusion (plain XLA, done once).
    wqkv = jnp.concatenate([params["wq"], params["wk"], params["wv"]], axis=1)  # (H, 3H)
    bqkv = jnp.concatenate([params["bq"], params["bk"], params["bv"]], axis=1)  # (1, 3H)

    out, probs = pl.pallas_call(
        bert_attention_kernel,
        grid=(B,),
        in_specs=[
            pl.BlockSpec((1, S, H), lambda b: (b, 0, 0)),       # x: per-batch tile
            pl.BlockSpec((1, 1, S), lambda b: (b, 0, 0)),       # mask: per-batch tile
            pl.BlockSpec((H, 3 * H), lambda b: (0, 0)),         # weights resident
            pl.BlockSpec((1, 3 * H), lambda b: (0, 0)),
            pl.BlockSpec((H, H), lambda b: (0, 0)),
            pl.BlockSpec((1, H), lambda b: (0, 0)),
            pl.BlockSpec((1, H), lambda b: (0, 0)),
            pl.BlockSpec((1, H), lambda b: (0, 0)),
        ],
        out_specs=(
            pl.BlockSpec((1, S, H), lambda b: (b, 0, 0)),
            pl.BlockSpec((1, nH, S, S), lambda b: (b, 0, 0, 0)),
        ),
        out_shape=(
            jax.ShapeDtypeStruct((B, S, H), jnp.float32),
            jax.ShapeDtypeStruct((B, nH, S, S), jnp.float32),
        ),
        compiler_params=pltpu.CompilerParams(
            dimension_semantics=("parallel",),
        ),
    )(x, mask, wqkv, bqkv, params["wo"], params["bo"],
      params["gamma"], params["beta"])

    return out, probs


def reference(x, mask, params):
    """Pure-JAX reference matching the PyTorch module (dropout = identity)."""
    B, S, H = x.shape
    q = x @ params["wq"] + params["bq"]
    k = x @ params["wk"] + params["bk"]
    v = x @ params["wv"] + params["bv"]

    def split(t):  # (B,S,H) -> (B,nH,S,hd)
        return t.reshape(B, S, NUM_HEADS, HEAD_DIM).transpose(0, 2, 1, 3)

    qh, kh, vh = split(q), split(k), split(v)
    scores = jnp.einsum("bhqd,bhkd->bhqk", qh, kh) / math.sqrt(HEAD_DIM)
    scores = scores + mask[:, None, :, :]            # mask (B,1,S) -> (B,1,1,S)
    probs = jax.nn.softmax(scores, axis=-1)
    ctx = jnp.einsum("bhqk,bhkd->bhqd", probs, vh)
    ctx = ctx.transpose(0, 2, 1, 3).reshape(B, S, H)
    dense = ctx @ params["wo"] + params["bo"]
    resid = dense + x
    mu = jnp.mean(resid, axis=-1, keepdims=True)
    var = jnp.mean((resid - mu) ** 2, axis=-1, keepdims=True)
    out = (resid - mu) / jnp.sqrt(var + LN_EPS) * params["gamma"] + params["beta"]
    return out, probs


if __name__ == "__main__":
    key = jax.random.PRNGKey(0)
    keys = jax.random.split(key, 12)

    def dense_w(k):
        # PyTorch Linear weight is (out, in); stored pre-transposed as (in, out)
        # so the kernel computes y = x @ W + b.
        return (0.02 * jax.random.normal(k, (HIDDEN, HIDDEN))).astype(jnp.float32)

    params = {
        "wq": dense_w(keys[0]),
        "bq": (0.02 * jax.random.normal(keys[1], (1, HIDDEN))).astype(jnp.float32),
        "wk": dense_w(keys[2]),
        "bk": (0.02 * jax.random.normal(keys[3], (1, HIDDEN))).astype(jnp.float32),
        "wv": dense_w(keys[4]),
        "bv": (0.02 * jax.random.normal(keys[5], (1, HIDDEN))).astype(jnp.float32),
        "wo": dense_w(keys[6]),
        "bo": (0.02 * jax.random.normal(keys[7], (1, HIDDEN))).astype(jnp.float32),
        "gamma": jnp.ones((1, HIDDEN), jnp.float32),
        "beta": jnp.zeros((1, HIDDEN), jnp.float32),
    }

    x = jax.random.normal(keys[8], (BATCH, SEQ, HIDDEN), dtype=jnp.float32)

    # Additive attention mask: 0 for attended tokens, -10000 for masked ones.
    valid = (jax.random.uniform(keys[9], (BATCH, 1, SEQ)) > 0.25).astype(jnp.float32)
    mask = (1.0 - valid) * -10000.0

    out, probs = bert_attention(x, mask, params)
    out, probs = jax.block_until_ready((out, probs))

    ref_out, ref_probs = reference(x, mask, params)

    assert np.allclose(np.asarray(out), np.asarray(ref_out), atol=1e-4, rtol=1e-4), \
        "attention_output mismatch"
    assert np.allclose(np.asarray(probs), np.asarray(ref_probs), atol=1e-5, rtol=1e-5), \
        "attention_probs mismatch"

    print("KERNEL_OK")
</pallas_src>

<mosaic_0001>
module attributes {stable_mosaic.version = 11 : i64} {
  func.func @bert_attention_kernel(%arg0: i32, %arg1: memref<1x8x32xf32, #tpu.memory_space<vmem>>, %arg2: memref<1x1x8xf32, #tpu.memory_space<vmem>>, %arg3: memref<32x96xf32, #tpu.memory_space<vmem>>, %arg4: memref<1x96xf32, #tpu.memory_space<vmem>>, %arg5: memref<32x32xf32, #tpu.memory_space<vmem>>, %arg6: memref<1x32xf32, #tpu.memory_space<vmem>>, %arg7: memref<1x32xf32, #tpu.memory_space<vmem>>, %arg8: memref<1x32xf32, #tpu.memory_space<vmem>>, %arg9: memref<1x8x32xf32, #tpu.memory_space<vmem>>, %arg10: memref<1x4x8x8xf32, #tpu.memory_space<vmem>>) attributes {dimension_semantics = [#tpu.dimension_semantics<parallel>], iteration_bounds = array<i64: 2>, scalar_prefetch = 0 : i64, scratch_operands = 0 : i64, tpu.core_type = #tpu.core_type<tc>, window_params = [{transform_indices = @transform_0, window_bounds = array<i64: 1, 8, 32>}, {transform_indices = @transform_1, window_bounds = array<i64: 1, 1, 8>}, {pipeline_mode = #tpu.pipeline_mode<synchronous>, transform_indices = @transform_2, window_bounds = array<i64: 32, 96>}, {pipeline_mode = #tpu.pipeline_mode<synchronous>, transform_indices = @transform_3, window_bounds = array<i64: 1, 96>}, {pipeline_mode = #tpu.pipeline_mode<synchronous>, transform_indices = @transform_4, window_bounds = array<i64: 32, 32>}, {pipeline_mode = #tpu.pipeline_mode<synchronous>, transform_indices = @transform_5, window_bounds = array<i64: 1, 32>}, {pipeline_mode = #tpu.pipeline_mode<synchronous>, transform_indices = @transform_6, window_bounds = array<i64: 1, 32>}, {pipeline_mode = #tpu.pipeline_mode<synchronous>, transform_indices = @transform_7, window_bounds = array<i64: 1, 32>}, {transform_indices = @transform_8, window_bounds = array<i64: 1, 8, 32>}, {transform_indices = @transform_9, window_bounds = array<i64: 1, 4, 8, 8>}]} {
    %c0 = arith.constant 0 : index
    %c0_0 = arith.constant 0 : index
    %c0_1 = arith.constant 0 : index
    %0 = vector.load %arg1[%c0, %c0_0, %c0_1] : memref<1x8x32xf32, #tpu.memory_space<vmem>>, vector<1x8x32xf32>
    %1 = vector.shape_cast %0 : vector<1x8x32xf32> to vector<8x32xf32>
    %c0_2 = arith.constant 0 : index
    %c0_3 = arith.constant 0 : index
    %2 = vector.load %arg3[%c0_2, %c0_3] : memref<32x96xf32, #tpu.memory_space<vmem>>, vector<32x96xf32>
    %cst = arith.constant dense<0.000000e+00> : vector<8x96xf32>
    %3 = tpu.matmul %1, %2, %cst {dimension_numbers = #tpu.dot_dimension_numbers<[1], [0], [0], [1], [0, 0, 1, 1], [], []>} : vector<8x32xf32>, vector<32x96xf32>, vector<8x96xf32> -> vector<8x96xf32>
    %c0_4 = arith.constant 0 : index
    %c0_5 = arith.constant 0 : index
    %4 = vector.load %arg4[%c0_4, %c0_5] : memref<1x96xf32, #tpu.memory_space<vmem>>, vector<1x96xf32>
    %5 = vector.broadcast %4 : vector<1x96xf32> to vector<8x96xf32>
    %6 = arith.addf %3, %5 : vector<8x96xf32>
    %7 = vector.extract_strided_slice %6 {offsets = [0, 0], sizes = [8, 8], strides = [1, 1]} : vector<8x96xf32> to vector<8x8xf32>
    %8 = vector.extract_strided_slice %6 {offsets = [0, 8], sizes = [8, 8], strides = [1, 1]} : vector<8x96xf32> to vector<8x8xf32>
    %9 = vector.extract_strided_slice %6 {offsets = [0, 16], sizes = [8, 8], strides = [1, 1]} : vector<8x96xf32> to vector<8x8xf32>
    %10 = vector.extract_strided_slice %6 {offsets = [0, 24], sizes = [8, 8], strides = [1, 1]} : vector<8x96xf32> to vector<8x8xf32>
    %11 = vector.shape_cast %7 : vector<8x8xf32> to vector<1x8x8xf32>
    %12 = vector.shape_cast %8 : vector<8x8xf32> to vector<1x8x8xf32>
    %13 = vector.shape_cast %9 : vector<8x8xf32> to vector<1x8x8xf32>
    %14 = vector.shape_cast %10 : vector<8x8xf32> to vector<1x8x8xf32>
    %15 = tpu.concatenate %11, %12, %13, %14 in 0 : vector<1x8x8xf32>, vector<1x8x8xf32>, vector<1x8x8xf32>, vector<1x8x8xf32> -> vector<4x8x8xf32>
    %16 = vector.extract_strided_slice %6 {offsets = [0, 32], sizes = [8, 8], strides = [1, 1]} : vector<8x96xf32> to vector<8x8xf32>
    %17 = vector.extract_strided_slice %6 {offsets = [0, 40], sizes = [8, 8], strides = [1, 1]} : vector<8x96xf32> to vector<8x8xf32>
    %18 = vector.extract_strided_slice %6 {offsets = [0, 48], sizes = [8, 8], strides = [1, 1]} : vector<8x96xf32> to vector<8x8xf32>
    %19 = vector.extract_strided_slice %6 {offsets = [0, 56], sizes = [8, 8], strides = [1, 1]} : vector<8x96xf32> to vector<8x8xf32>
    %20 = vector.shape_cast %16 : vector<8x8xf32> to vector<1x8x8xf32>
    %21 = vector.shape_cast %17 : vector<8x8xf32> to vector<1x8x8xf32>
    %22 = vector.shape_cast %18 : vector<8x8xf32> to vector<1x8x8xf32>
    %23 = vector.shape_cast %19 : vector<8x8xf32> to vector<1x8x8xf32>
    %24 = tpu.concatenate %20, %21, %22, %23 in 0 : vector<1x8x8xf32>, vector<1x8x8xf32>, vector<1x8x8xf32>, vector<1x8x8xf32> -> vector<4x8x8xf32>
    %25 = vector.extract_strided_slice %6 {offsets = [0, 64], sizes = [8, 8], strides = [1, 1]} : vector<8x96xf32> to vector<8x8xf32>
    %26 = vector.extract_strided_slice %6 {offsets = [0, 72], sizes = [8, 8], strides = [1, 1]} : vector<8x96xf32> to vector<8x8xf32>
    %27 = vector.extract_strided_slice %6 {offsets = [0, 80], sizes = [8, 8], strides = [1, 1]} : vector<8x96xf32> to vector<8x8xf32>
    %28 = vector.extract_strided_slice %6 {offsets = [0, 88], sizes = [8, 8], strides = [1, 1]} : vector<8x96xf32> to vector<8x8xf32>
    %29 = vector.shape_cast %25 : vector<8x8xf32> to vector<1x8x8xf32>
    %30 = vector.shape_cast %26 : vector<8x8xf32> to vector<1x8x8xf32>
    %31 = vector.shape_cast %27 : vector<8x8xf32> to vector<1x8x8xf32>
    %32 = vector.shape_cast %28 : vector<8x8xf32> to vector<1x8x8xf32>
    %33 = tpu.concatenate %29, %30, %31, %32 in 0 : vector<1x8x8xf32>, vector<1x8x8xf32>, vector<1x8x8xf32>, vector<1x8x8xf32> -> vector<4x8x8xf32>
    "tpu.trace_start"() <{level = 10 : i32, message = "hqd,hkd->hqk"}> : () -> ()
    %cst_6 = arith.constant dense<0.000000e+00> : vector<4x8x8xf32>
    %34 = tpu.matmul %15, %24, %cst_6 {dimension_numbers = #tpu.dot_dimension_numbers<[2], [2], [1], [1], [0, 0, 0, 1, 1, 1], [0], [0]>} : vector<4x8x8xf32>, vector<4x8x8xf32>, vector<4x8x8xf32> -> vector<4x8x8xf32>
    "tpu.trace_stop"() : () -> ()
    %cst_7 = arith.constant 0.353553385 : f32
    %35 = vector.broadcast %cst_7 : f32 to vector<4x8x8xf32>
    %36 = arith.mulf %34, %35 : vector<4x8x8xf32>
    %c0_8 = arith.constant 0 : index
    %c0_9 = arith.constant 0 : index
    %c0_10 = arith.constant 0 : index
    %37 = vector.load %arg2[%c0_8, %c0_9, %c0_10] : memref<1x1x8xf32, #tpu.memory_space<vmem>>, vector<1x1x8xf32>
    %38 = vector.broadcast %37 : vector<1x1x8xf32> to vector<4x8x8xf32>
    %39 = arith.addf %36, %38 : vector<4x8x8xf32>
    %cst_11 = arith.constant dense<0xFF800000> : vector<4x8xf32>
    %40 = vector.multi_reduction <maximumf>, %39, %cst_11 [2] : vector<4x8x8xf32> to vector<4x8xf32>
    %41 = vector.shape_cast %40 : vector<4x8xf32> to vector<4x8x1xf32>
    %42 = vector.broadcast %41 : vector<4x8x1xf32> to vector<4x8x8xf32>
    %43 = arith.subf %39, %42 : vector<4x8x8xf32>
    %44 = math.exp %43 : vector<4x8x8xf32>
    %cst_12 = arith.constant dense<0.000000e+00> : vector<4x8xf32>
    %45 = vector.multi_reduction <add>, %44, %cst_12 [2] : vector<4x8x8xf32> to vector<4x8xf32>
    %46 = vector.shape_cast %45 : vector<4x8xf32> to vector<4x8x1xf32>
    %47 = tpu.reciprocal %46 : vector<4x8x1xf32> -> vector<4x8x1xf32>
    %48 = vector.broadcast %47 : vector<4x8x1xf32> to vector<4x8x8xf32>
    %49 = arith.mulf %44, %48 : vector<4x8x8xf32>
    %c0_13 = arith.constant 0 : index
    %c0_14 = arith.constant 0 : index
    %c0_15 = arith.constant 0 : index
    %c0_16 = arith.constant 0 : index
    %50 = vector.load %arg10[%c0_13, %c0_14, %c0_15, %c0_16] : memref<1x4x8x8xf32, #tpu.memory_space<vmem>>, vector<1x4x8x8xf32>
    %51 = vector.shape_cast %50 : vector<1x4x8x8xf32> to vector<4x8x8xf32>
    %52 = vector.shape_cast %49 : vector<4x8x8xf32> to vector<1x4x8x8xf32>
    tpu.vector_store %arg10[%c0_13, %c0_14, %c0_15, %c0_16], %52 {strides = array<i32>} : memref<1x4x8x8xf32, #tpu.memory_space<vmem>>, vector<1x4x8x8xf32>,
    "tpu.trace_start"() <{level = 10 : i32, message = "hqk,hkd->hqd"}> : () -> ()
    %cst_17 = arith.constant dense<0.000000e+00> : vector<4x8x8xf32>
    %53 = tpu.matmul %49, %33, %cst_17 {dimension_numbers = #tpu.dot_dimension_numbers<[2], [1], [1], [2], [0, 0, 0, 1, 1, 2], [0], [0]>} : vector<4x8x8xf32>, vector<4x8x8xf32>, vector<4x8x8xf32> -> vector<4x8x8xf32>
    "tpu.trace_stop"() : () -> ()
    %54 = vector.extract_strided_slice %53 {offsets = [0, 0, 0], sizes = [1, 8, 8], strides = [1, 1, 1]} : vector<4x8x8xf32> to vector<1x8x8xf32>
    %55 = vector.shape_cast %54 : vector<1x8x8xf32> to vector<8x8xf32>
    %56 = vector.extract_strided_slice %53 {offsets = [1, 0, 0], sizes = [1, 8, 8], strides = [1, 1, 1]} : vector<4x8x8xf32> to vector<1x8x8xf32>
    %57 = vector.shape_cast %56 : vector<1x8x8xf32> to vector<8x8xf32>
    %58 = vector.extract_strided_slice %53 {offsets = [2, 0, 0], sizes = [1, 8, 8], strides = [1, 1, 1]} : vector<4x8x8xf32> to vector<1x8x8xf32>
    %59 = vector.shape_cast %58 : vector<1x8x8xf32> to vector<8x8xf32>
    %60 = vector.extract_strided_slice %53 {offsets = [3, 0, 0], sizes = [1, 8, 8], strides = [1, 1, 1]} : vector<4x8x8xf32> to vector<1x8x8xf32>
    %61 = vector.shape_cast %60 : vector<1x8x8xf32> to vector<8x8xf32>
    %62 = tpu.concatenate %55, %57, %59, %61 in 1 : vector<8x8xf32>, vector<8x8xf32>, vector<8x8xf32>, vector<8x8xf32> -> vector<8x32xf32>
    %c0_18 = arith.constant 0 : index
    %c0_19 = arith.constant 0 : index
    %63 = vector.load %arg5[%c0_18, %c0_19] : memref<32x32xf32, #tpu.memory_space<vmem>>, vector<32x32xf32>
    %cst_20 = arith.constant dense<0.000000e+00> : vector<8x32xf32>
    %64 = tpu.matmul %62, %63, %cst_20 {dimension_numbers = #tpu.dot_dimension_numbers<[1], [0], [0], [1], [0, 0, 1, 1], [], []>} : vector<8x32xf32>, vector<32x32xf32>, vector<8x32xf32> -> vector<8x32xf32>
    %c0_21 = arith.constant 0 : index
    %c0_22 = arith.constant 0 : index
    %65 = vector.load %arg6[%c0_21, %c0_22] : memref<1x32xf32, #tpu.memory_space<vmem>>, vector<1x32xf32>
    %66 = vector.broadcast %65 : vector<1x32xf32> to vector<8x32xf32>
    %67 = arith.addf %64, %66 : vector<8x32xf32>
    %68 = arith.addf %67, %1 : vector<8x32xf32>
    %cst_23 = arith.constant dense<0.000000e+00> : vector<8xf32>
    %69 = vector.multi_reduction <add>, %68, %cst_23 [1] : vector<8x32xf32> to vector<8xf32>
    %70 = vector.shape_cast %69 : vector<8xf32> to vector<8x1xf32>
    %cst_24 = arith.constant 3.200000e+01 : f32
    %71 = vector.broadcast %cst_24 : f32 to vector<8x1xf32>
    %72 = arith.divf %70, %71 : vector<8x1xf32>
    %73 = vector.broadcast %72 : vector<8x1xf32> to vector<8x32xf32>
    %74 = arith.subf %68, %73 : vector<8x32xf32>
    %75 = arith.mulf %74, %74 : vector<8x32xf32>
    %cst_25 = arith.constant dense<0.000000e+00> : vector<8xf32>
    %76 = vector.multi_reduction <add>, %75, %cst_25 [1] : vector<8x32xf32> to vector<8xf32>
    %77 = vector.shape_cast %76 : vector<8xf32> to vector<8x1xf32>
    %cst_26 = arith.constant 3.200000e+01 : f32
    %78 = vector.broadcast %cst_26 : f32 to vector<8x1xf32>
    %79 = arith.divf %77, %78 : vector<8x1xf32>
    %80 = vector.broadcast %72 : vector<8x1xf32> to vector<8x32xf32>
    %81 = arith.subf %68, %80 : vector<8x32xf32>
    %cst_27 = arith.constant 9.99999996E-13 : f32
    %82 = vector.broadcast %cst_27 : f32 to vector<8x1xf32>
    %83 = arith.addf %79, %82 : vector<8x1xf32>
    %84 = math.rsqrt %83 : vector<8x1xf32>
    %85 = vector.broadcast %84 : vector<8x1xf32> to vector<8x32xf32>
    %86 = arith.mulf %81, %85 : vector<8x32xf32>
    %c0_28 = arith.constant 0 : index
    %c0_29 = arith.constant 0 : index
    %87 = vector.load %arg7[%c0_28, %c0_29] : memref<1x32xf32, #tpu.memory_space<vmem>>, vector<1x32xf32>
    %88 = vector.broadcast %87 : vector<1x32xf32> to vector<8x32xf32>
    %89 = arith.mulf %86, %88 : vector<8x32xf32>
    %c0_30 = arith.constant 0 : index
    %c0_31 = arith.constant 0 : index
    %90 = vector.load %arg8[%c0_30, %c0_31] : memref<1x32xf32, #tpu.memory_space<vmem>>, vector<1x32xf32>
    %91 = vector.broadcast %90 : vector<1x32xf32> to vector<8x32xf32>
    %92 = arith.addf %89, %91 : vector<8x32xf32>
    %c0_32 = arith.constant 0 : index
    %c0_33 = arith.constant 0 : index
    %c0_34 = arith.constant 0 : index
    %93 = vector.load %arg9[%c0_32, %c0_33, %c0_34] : memref<1x8x32xf32, #tpu.memory_space<vmem>>, vector<1x8x32xf32>
    %94 = vector.shape_cast %93 : vector<1x8x32xf32> to vector<8x32xf32>
    %95 = vector.shape_cast %92 : vector<8x32xf32> to vector<1x8x32xf32>
    tpu.vector_store %arg9[%c0_32, %c0_33, %c0_34], %95 {strides = array<i32>} : memref<1x8x32xf32, #tpu.memory_space<vmem>>, vector<1x8x32xf32>,
    return
  }
  func.func @transform_0(%arg0: i32) -> (i32, i32, i32) {
    %c0_i32 = arith.constant 0 : i32
    %c0_i32_0 = arith.constant 0 : i32
    %c0_i32_1 = arith.constant 0 : i32
    return %arg0, %c0_i32, %c0_i32_0 : i32, i32, i32
  }
  func.func @transform_1(%arg0: i32) -> (i32, i32, i32) {
    %c0_i32 = arith.constant 0 : i32
    %c0_i32_0 = arith.constant 0 : i32
    %c0_i32_1 = arith.constant 0 : i32
    return %arg0, %c0_i32, %c0_i32_0 : i32, i32, i32
  }
  func.func @transform_2(%arg0: i32) -> (i32, i32) {
    %c0_i32 = arith.constant 0 : i32
    %c0_i32_0 = arith.constant 0 : i32
    %c0_i32_1 = arith.constant 0 : i32
    return %c0_i32, %c0_i32_0 : i32, i32
  }
  func.func @transform_3(%arg0: i32) -> (i32, i32) {
    %c0_i32 = arith.constant 0 : i32
    %c0_i32_0 = arith.constant 0 : i32
    %c0_i32_1 = arith.constant 0 : i32
    return %c0_i32, %c0_i32_0 : i32, i32
  }
  func.func @transform_4(%arg0: i32) -> (i32, i32) {
    %c0_i32 = arith.constant 0 : i32
    %c0_i32_0 = arith.constant 0 : i32
    %c0_i32_1 = arith.constant 0 : i32
    return %c0_i32, %c0_i32_0 : i32, i32
  }
  func.func @transform_5(%arg0: i32) -> (i32, i32) {
    %c0_i32 = arith.constant 0 : i32
    %c0_i32_0 = arith.constant 0 : i32
    %c0_i32_1 = arith.constant 0 : i32
    return %c0_i32, %c0_i32_0 : i32, i32
  }
  func.func @transform_6(%arg0: i32) -> (i32, i32) {
    %c0_i32 = arith.constant 0 : i32
    %c0_i32_0 = arith.constant 0 : i32
    %c0_i32_1 = arith.constant 0 : i32
    return %c0_i32, %c0_i32_0 : i32, i32
  }
  func.func @transform_7(%arg0: i32) -> (i32, i32) {
    %c0_i32 = arith.constant 0 : i32
    %c0_i32_0 = arith.constant 0 : i32
    %c0_i32_1 = arith.constant 0 : i32
    return %c0_i32, %c0_i32_0 : i32, i32
  }
  func.func @transform_8(%arg0: i32) -> (i32, i32, i32) {
    %c0_i32 = arith.constant 0 : i32
    %c0_i32_0 = arith.constant 0 : i32
    %c0_i32_1 = arith.constant 0 : i32
    return %arg0, %c0_i32, %c0_i32_0 : i32, i32, i32
  }
  func.func @transform_9(%arg0: i32) -> (i32, i32, i32, i32) {
    %c0_i32 = arith.constant 0 : i32
    %c0_i32_0 = arith.constant 0 : i32
    %c0_i32_1 = arith.constant 0 : i32
    %c0_i32_2 = arith.constant 0 : i32
    return %arg0, %c0_i32, %c0_i32_0, %c0_i32_1 : i32, i32, i32, i32
  }
}

</mosaic_0001>

<bundles_post_ra>
// kernel: tpu_custom_call.1
= control target key start
LH: loop header
LB: loop body
LE: loop exit
PB: predicated region body
PF: predicated region fallthrough
CT: control target
= control target key end

     0   :  { %s1794_s0 = inlined_call_operand.hbm [shape: f32[2,8,32], index: 0, kind: input, shape index: {}]   ;;  %s1795_s1 = inlined_call_operand.hbm [shape: f32[2,1,8], index: 1, kind: input, shape index: {}]   ;;  %s1796_s2 = inlined_call_operand.hbm [shape: f32[32,96], index: 2, kind: input, shape index: {}]   ;;  %s1797_s3 = inlined_call_operand.vmem [shape: f32[1,96], index: 3, kind: input, shape index: {}]   ;;  %s1798_s4 = inlined_call_operand.hbm [shape: f32[32,32], index: 4, kind: input, shape index: {}]   ;;  %s1799_s5 = inlined_call_operand.vmem [shape: f32[1,32], index: 5, kind: input, shape index: {}]   ;;  %s1800_s6 = inlined_call_operand.vmem [shape: f32[1,32], index: 6, kind: input, shape index: {}]   ;;  %s1801_s7 = inlined_call_operand.vmem [shape: f32[1,32], index: 7, kind: input, shape index: {}]   ;;  %s1802_s8 = inlined_call_operand.hbm [shape: f32[2,8,32], index: 8, kind: output, shape index: {0}]   ;;  %s1803_s9 = inlined_call_operand.hbm [shape: f32[2,4,8,8], index: 9, kind: output, shape index: {1}]  }
   0x1   :  { %1809 = sst [smem:[#allocation24_spill]] %s1796_s2 }
   0x2   :  { %1810 = sst [smem:[#allocation25_spill]] %s1798_s4 }
   0x3   :  { %15 = vsyncpa [#allocation3], 0 }
   0x4   :  { %17 = vsyncpa [#allocation3 + $0x1], 0 }
   0x5   :  { %18 = vsyncpa [#allocation6], 0 }
   0x6   :  { %20 = vsyncpa [#allocation6 + $0x1], 0 }
   0x7   :  { %21 = vsyncpa [#allocation9], 0 }
   0x8   :  { %22 = vsyncpa [#allocation4], 0 }
   0x9   :  { %24 = vsyncpa [#allocation4 + $0x1], 0 }
   0xa   :  { %25 = vsyncpa [#allocation12], 0 }
   0xb   :  { %27 = vsyncpa [#allocation12 + $0x1], 0  ;;  %s1508_s30 = smov 0   ;;  %s1510_s10 = smov 0  }
   0xc   :  { %s1512_s11 = smov 0   ;;  %s1514_s12 = smov 0  }
   0xd LB: > { %1811 = sst [smem:[#allocation19_spill]] %s1430_s30  ;;  %s1532_s16 = sadd.s32 4294967295, %s1442_s12   ;;  %s1442_s12 = sphi %s1514_s12, %s1827_s12   ;;  %s1438_s11 = sphi %s1512_s11, %s1829_s11   ;;  %s1434_s10 = sphi %s1510_s10, %s1831_s10   ;;  %s1430_s30 = sphi %s1508_s30, %s1830_s30  }
   0xe   : > { %1812 = sst [smem:[#allocation20_spill]] %s1438_s11  ;;  %p1059_p0 = scmp.ge.s32.totalorder %s1442_s12, 1 }
   0xf   : > { %s1813_s2 = sld [smem:[#allocation24_spill]]  ;;  %p54_p1 = scmp.eq.s32.totalorder %s1532_s16, 0 }
  0x10   : > { %p268_p2 = scmp.lt.s32.totalorder %s1442_s12, 3  ;;  %s1444_s18 = smov [#allocation7]  }
  0x11   : > { %s281_s19 = sshll.u32 %s1444_s18, 4  ;;  %s1815_s4 = sld [smem:[#allocation25_spill]]  ;;  %s282_s19 = int_to_ptr.vmem [resolvable:$true] %s281_s19 }
  0x12   : > { %p1537_p3 = pnand %p1059_p0, %p268_p2  ;;  %s1445_s23 = smov [#allocation8]  }
  0x13   : > { %s298_s24 = sshll.u32 %s1445_s23, 4  ;;  %s1446_s25 = smov 128   ;;  %s299_s24 = int_to_ptr.vmem [resolvable:$true] %s298_s24 }
  0x14   : > { %p1109_p4 = pneg %p1537_p3  ;;  %s1447_s26 = smov 8  }
  0x15   : > { %s279_s15 = sshll.u32 %s1813_s2, 4  ;;  %s1058_s27 = sadd.s32 4294967294, %s1442_s12   ;;  %s280_s15 = int_to_ptr.hbm [resolvable:$true] %s279_s15 }
  0x16   : > { %p1110_p6 = pnand %p1109_p4, %p54_p1  ;;  %s1551_s28 = sadd.s32 1, %s1442_s12  }
  0x17   : > { %s296_s22 = sshll.u32 %s1815_s4, 4  ;;  %1816 = sst [smem:[#allocation21_spill]] %s1551_s28  ;;  %s297_s22 = int_to_ptr.hbm [resolvable:$true] %s296_s22 }
  0x18   : > { %1112 = dma.hbm_to_vmem [thread:$0]  (!%p1110_p6), %s280_s15, 512, %s282_s19, [#allocation6], %s1446_s25, %s1446_s25, %s1447_s26  }
  0x19   : > { %1115 = dma.hbm_to_vmem [thread:$0]  (!%p1110_p6), %s297_s22, 512, %s299_s24, [#allocation9], %s1446_s25, %s1446_s25, %s1447_s26  }
  0x1a   : > { %s37_s29 = ssub.s32 %s1442_s12, %s1551_s28  ;;  %s40_s13 = sadd.s32 1, %s1438_s11 }
  0x1b   : > { %p38_p7 = scmp.eq.s32.totalorder %s37_s29, 0  ;;  %p47_p8 = scmp.ne.s32.totalorder %s1438_s11, %s1434_s10 }
  0x1c   : > { %p48_p9 = scmp.eq.s32.totalorder %s1442_s12, 0  ;;  %p53_p10 = scmp.ne.s32.totalorder %s1434_s10, %s1430_s30 }
  0x1d   : > { %s1562_s14 = scalar_select %p38_p7, %s1438_s11, %s40_s13  }
  0x1e   : > { %p1564_p11 = por %p48_p9, %p47_p8  ;;  %p1570_p12 = por %p54_p1, %p53_p10 }
  0x1f   : > { %1817 = sst [smem:[#allocation22_spill]] %s1562_s14  ;;  %p229_p13 = scmp.eq.s32.totalorder %s1532_s16, 1 }
  0x20   : > { %p235_p0 = scmp.eq.s32.totalorder %s1058_s27, 1  ;;  %p1132_p2 = scmp.lt.s32.totalorder %s1442_s12, 2 }
  0x21   : > { %s1577_s19 = sand.u32 1, %s1438_s11   ;;  %p1579_p4 = por %p229_p13, %p47_p8 }
  0x22   : > { %p1583_p6 = por %p235_p0, %p53_p10  ;;  %s1063_s22 = sshll.u32 %s1577_s19, 3 }
  0x23   : > { %s1064_s23 = sshll.u32 %s1442_s12, 3  ;;  %s325_s27 = scalar_lea.vmem [#allocation2], %s1063_s22 }
  0x24   : > { %s1821_s21 = scalar_select %p1583_p6, 1, 0 }
  0x25   : > { %s329_s26 = scalar_lea.hbm %s1794_s0, %s1064_s23  ;;  %s333_s29 = sshll.u32 %s325_s27, 4  ;;  %s334_s29 = int_to_ptr.vmem [resolvable:$true] %s333_s29 }
  0x26   : > { %1822 = sst [smem:[#allocation23_spill]] %s1821_s21  ;;  %s331_s13 = sshll.u32 %s329_s26, 4  ;;  %s332_s13 = int_to_ptr.hbm [resolvable:$true] %s331_s13 }
  0x27   : > { %p1594_p7 = pnand %p1132_p2, %p1564_p11  ;;  %s340_s4 = sand.u32 1, %s1442_s12  }
  0x28   : > { %s322_s14 = scalar_lea.sflag [#allocation3], %s1577_s19  ;;  %s1272_s11 = sshra.s32 %s332_s13, 4  ;;  %s1273_s11 = int_to_ptr.hbm [resolvable:$true] %s1272_s11 }
  0x29   : > { %s1274_s28 = scalar_lea.hbm %s1273_s11, 8  ;;  %p1276_p9 = pneg %p1594_p7 }
  0x2a   : > { %p1275_p8 = scmp.ne.s32.totalorder %s1273_s11, %s1274_s28  ;;  %s1279_s23 = scalar_lea.hbm %s1794_s0, 16 }
  0x2b   : > { %p1280_p11 = scmp.lt.s32.totalorder %s1273_s11, %s1794_s0  ;;  %p1281_p0 = scmp.lt.s32.totalorder %s1279_s23, %s1274_s28 }
  0x2c   : > { %p1277_p10 = pnand %p1276_p9, %p1275_p8 }
  0x2d   : > { %p1282_p2 = por %p1281_p0, %p1280_p11 }
  0x2e   : > { %p1278_p13 = pneg %p1277_p10 }
  0x30   : > { %p1283_p5 = pnand %p1282_p2, %p1278_p13 }
  0x32   : > { %1286 = shalt.err (!%p1283_p5)
}
  0x33   : > { %1119 = dma.hbm_to_vmem [thread:$0]  (!%p1594_p7), %s332_s13, 128, %s334_s29, %s322_s14  }
  0x34   : > { %s346_s21 = scalar_lea.hbm %s1795_s1, %s1442_s12  ;;  %s343_s22 = scalar_lea.vmem [#allocation5], %s1577_s19 }
  0x35   : > { %s350_s18 = sshll.u32 %s343_s22, 4  ;;  %s348_s30 = sshll.u32 %s346_s21, 4  ;;  %s351_s18 = int_to_ptr.vmem [resolvable:$true] %s350_s18  ;;  %s349_s30 = int_to_ptr.hbm [resolvable:$true] %s348_s30 }
  0x36   : > { %s341_s11 = scalar_lea.sflag [#allocation6], %s340_s4  ;;  %s1302_s28 = sshra.s32 %s349_s30, 4  ;;  %s1303_s28 = int_to_ptr.hbm [resolvable:$true] %s1302_s28 }
  0x37   : > { %s1304_s23 = scalar_lea.hbm %s1303_s28, 1  ;;  %s1309_s29 = scalar_lea.hbm %s1795_s1, 2 }
  0x38   : > { %p1305_p5 = scmp.ne.s32.totalorder %s1303_s28, %s1304_s23  ;;  %p1310_p13 = scmp.lt.s32.totalorder %s1303_s28, %s1795_s1 }
  0x39   : > { %p1311_p11 = scmp.lt.s32.totalorder %s1309_s29, %s1304_s23 }
  0x3a   : > { %p1307_p8 = pnand %p1305_p5, %p1276_p9 }
  0x3b   : > { %p1312_p0 = por %p1311_p11, %p1310_p13 }
  0x3c   : > { %p1308_p10 = pneg %p1307_p8 }
  0x3e   : > { %p1313_p2 = pnand %p1312_p0, %p1308_p10 }
  0x40   : > { %1316 = shalt.err (!%p1313_p2)
}
  0x41   : > { %1122 = dma.hbm_to_vmem [thread:$0]  (!%p1594_p7), %s349_s30, 16, %s351_s18, %s341_s11  }
  0x42   : > { %359 = sbr.rel (%p1537_p3) target bundleno = 1518 (0x5ee), region = 52  ;;  %s1632_s4 = sand.u32 (!%p1537_p3), 1, %s1434_s10  }
  0x43   : > { %s1066_s19 = sshll.u32 (!%p1537_p3), %s1632_s4, 3  ;;  %s362_s21 = scalar_lea.sflag (!%p1537_p3), [#allocation3], %s1632_s4 }
  0x44   : > { %s365_s26 = scalar_lea.vmem (!%p1537_p3), [#allocation2], %s1066_s19 }
  0x47   : > { %1405 = dma.done.wait (%p1570_p12), %s362_s21, 128  }
  0x48   : > { %1407 = vsyncadd (%p1570_p12), %s362_s21, 4294967168  ;;  %s371_s2 = sand.u32 1, %s1532_s16   ;;  %s374_s17 = scalar_lea.vmem [#allocation5], %s1632_s4 }
  0x49   : > { %s372_s30 = scalar_lea.sflag [#allocation6], %s371_s2 }
  0x4a   : > { %1409 = dma.done.wait (%p1570_p12), %s372_s30, 16  }
  0x4b   : > { %1411 = vsyncadd (%p1570_p12), %s372_s30, 4294967280 }
  0x4c   : > { %1413 = dma.done.wait (%p54_p1), [#allocation6], 512  }
  0x4d   : > { %1415 = vsyncadd (%p54_p1), [#allocation6], 4294966784 }
  0x4e   : > { %1417 = dma.done.wait (%p54_p1), [#allocation9], 512  }
  0x4f   : > { %1419 = vsyncadd (%p54_p1), [#allocation9], 4294966784  ;;  %v433_v0 = vld [vmem:[#allocation7 + $0x18] sm:$0xff]  ;;  %v432_v1 = vld [vmem:[#allocation7 + $0x10] sm:$0xff]  ;;  %vm438_vm0 = vcmask 261120   ;;  %s1448_s22 = smov 96  }
  0x50   : > { %454 = vmatpush.msra.mxu0 %v433_v0  ;;  %v431_v2 = vld [vmem:[#allocation7 + $0x8] sm:$0xff]  ;;  %v430_v3 = vld [vmem:[#allocation7] sm:$0xff]  ;;  %s1449_s18 = smov 104   ;;  %s1450_s11 = smov 120   ;;  %vm471_vm1 = vcmask 64512  }
  0x51   : > { %v1656_v4 = vld [vmem:[%s365_s26] sm:$0xff]  ;;  %s1451_s28 = smov 112   ;;  %s1452_s23 = smov 64  }
  0x52   : > { %455 = vmatpush.msra.mxu0 %v432_v1  ;;  %v1187_v5 = vld [vmem:[%s1797_s3] ss:$0 sm:$0xff]  ;;  %s1070_s24 = sshll.u32 %s1632_s4, 5  ;;  %s1453_s29 = smov 16  }
  0x53   : > { %v1188_v18 = vld [vmem:[%s374_s17] ss:$0 sm:$0xff]  ;;  %s1709_s14 = scalar_lea.vmem [#allocation11], %s1070_s24  ;;  %s1454_s13 = smov 8  }
  0x54   : > { %456 = vmatpush.msra.mxu0 %v431_v2  ;;  %s1455_s25 = smov 24   ;;  %s1092_s2 = sshll.u32 %s1532_s16, 5 }
  0x55   : > { %s910_s15 = scalar_lea.hbm %s1803_s9, %s1092_s2  ;;  %s911_s27 = sshll.u32 %s1709_s14, 4  ;;  %s912_s27 = int_to_ptr.vmem [resolvable:$true] %s911_s27 }
  0x56   : > { %457 = vmatpush.msra.mxu0 %v430_v3 }
  0x57   : > { %1071 = vmatmul.msk.f32.vlgmr.msra.gmra.mxu0 %vm438_vm0, %v1656_v4 }
  0xd4   : > { %v459_v6 = vpop.f32.mrf.mxu0 }
  0xd5   : > { %v1663_v7 = vadd.f32 %v1187_v5, %v459_v6 }
  0xd7   : > { %469 = vrot.lane.b32.xlu2 %v1663_v7, %s1448_s22  ;;  %467 = vrot.lane.b32.xlu1 %v1663_v7, %s1449_s18  ;;  %s885_s18 = scalar_lea.sflag [#allocation12], %s1632_s4 }
  0xd8   : > { %463 = vrot.lane.b32.xlu0 %v1663_v7, %s1450_s11 }
  0xe0   : > { %465 = vrot.lane.b32.xlu0 %v1663_v7, %s1451_s28 }
 0x131   : > { %v470_v8 = vpop.permute.xlu2 %469 }
 0x132   : > { %1072 = vmatpush.xpose.msk.msra.mxu1 %vm471_vm1, %v470_v8 }
 0x135   : > { %1073 = vmatmul.msk.f32.vlgmr.msra.gmra.mxu1 %vm471_vm1, %v1663_v7 }
 0x149   : > { %v1672_v9 = vpop.permute.xlu1 %467 }
 0x14a   : > { %v1674_v10 = vpop.permute.xlu0 %463  ;;  %548 = vrot.lane.b32.xlu0 %v1672_v9, %s1448_s22 }
 0x14b   : > { %496 = vrot.lane.b32.xlu1 %v1674_v10, %s1448_s22 }
 0x152   : > { %v466_v11 = vpop.permute.xlu0 %465 }
 0x153   : > { %522 = vrot.lane.b32.xlu2 %v466_v11, %s1448_s22  ;;  %v1182_v52 = vpack.i.bf16 %v1672_v9, %v466_v11  ;;  %s913_s22 = sshll.u32 %s910_s15, 4  ;;  %s914_s22 = int_to_ptr.hbm [resolvable:$true] %s913_s22 }
 0x154   : > { %s1346_s11 = sshra.s32 %s914_s22, 4  ;;  %s1347_s11 = int_to_ptr.hbm [resolvable:$true] %s1346_s11 }
 0x155   : > { %s1348_s28 = scalar_lea.hbm %s1347_s11, 32  ;;  %p1353_p7 = scmp.lt.s32.totalorder %s1347_s11, %s1803_s9 }
 0x156   : > { %p1349_p1 = scmp.ne.s32.totalorder %s1347_s11, %s1348_s28 }
 0x158   : > { %p1350_p3 = pnand %p1349_p1, %p1579_p4 }
 0x15a   : > { %p1351_p12 = pneg %p1350_p3 }
 0x1ad   : > { %v523_v12 = vpop.permute.xlu2 %522 }
 0x1ae   : > { %1076 = vmatpush.xpose.msk.msra.mxu3 %vm471_vm1, %v523_v12 }
 0x1b1   : > { %1077 = vmatmul.msk.f32.vlgmr.msra.gmra.mxu3 %vm471_vm1, %v466_v11 }
 0x1b2   : > { %v493_v16 = vpop.f32.mrf.mxu1 }
 0x1b3   : > { %v574_v20 = vmul.f32 0.35355338, %v493_v16 }
 0x1b5   : > { %v582_v23 = vadd.f32 %v1188_v18, %v574_v20 }
 0x1b7   : > { %v586_v26 = vsel %vm471_vm1, %v582_v23, -inf }
 0x1bc   : > { %v549_v13 = vpop.permute.xlu0 %548 }
 0x1bd   : > { %v497_v14 = vpop.permute.xlu1 %496  ;;  %1078 = vmatpush.xpose.msk.msrb.mxu1 %vm471_vm1, %v549_v13 }
 0x1be   : > { %1074 = vmatpush.xpose.msk.msra.mxu2 %vm471_vm1, %v497_v14 }
 0x1c0   : > { %1079 = vmatmul.msk.f32.vlgmr.msrb.gmra.mxu1 %vm471_vm1, %v1672_v9 }
 0x1c1   : > { %1075 = vmatmul.msk.f32.vlgmr.msra.gmra.mxu2 %vm471_vm1, %v1674_v10 }
 0x234   : > { %v545_v15 = vpop.f32.mrf.mxu3 }
 0x235   : > { %v576_v17 = vmul.f32 0.35355338, %v545_v15 }
 0x237   : > { %v584_v19 = vadd.f32 %v1188_v18, %v576_v17 }
 0x239   : > { %v592_v21 = vsel %vm471_vm1, %v584_v19, -inf }
 0x23a   : > { %593 = vmax.xlane.f32.xlu2 %v592_v21 }
 0x23d   : > { %v571_v22 = vpop.f32.mrf.mxu1 }
 0x23e   : > { %v577_v24 = vmul.f32 0.35355338, %v571_v22 }
 0x240   : > { %v585_v25 = vadd.f32 %v1188_v18, %v577_v24 }
 0x242   : > { %587 = vmax.xlane.f32.xlu2 %v586_v26  ;;  %v595_v27 = vsel %vm471_vm1, %v585_v25, -inf }
 0x243   : > { %596 = vmax.xlane.f32.xlu0 %v595_v27 }
 0x244   : > { %v519_v28 = vpop.f32.mrf.mxu2 }
 0x245   : > { %v575_v29 = vmul.f32 0.35355338, %v519_v28 }
 0x247   : > { %v583_v30 = vadd.f32 %v1188_v18, %v575_v29 }
 0x249   : > { %v589_v31 = vsel %vm471_vm1, %v583_v30, -inf }
 0x24a   : > { %590 = vmax.xlane.f32.xlu1 %v589_v31 }
 0x2ad   : > { %v594_v32 = vpop.xlane.xlu2 %593 }
 0x2ae   : > { %v600_v33 = vsub.f32 %v584_v19, %v594_v32 }
 0x2b0   : > { %v606_v34 = vmul.f32 1.442695, %v600_v33 }
 0x2b2   : > { %1192 = vpow2.f32 %v606_v34 }
 0x2b5   : > { %v588_v35 = vpop.xlane.xlu2 %587 }
 0x2b6   : > { %v597_v36 = vpop.xlane.xlu0 %596  ;;  %v598_v39 = vsub.f32 %v582_v23, %v588_v35 }
 0x2b7   : > { %v601_v37 = vsub.f32 %v585_v25, %v597_v36 }
 0x2b8   : > { %v1193_v38 = vpop.eup %1192  ;;  %v602_v42 = vmul.f32 1.442695, %v598_v39 }
 0x2b9   : > { %v608_v40 = vmul.f32 1.442695, %v601_v37  ;;  %v616_v41 = vsel %vm471_vm1, %v1193_v38, 0.0 }
 0x2ba   : > { %617 = vadd.xlane.f32.xlu2 %v616_v41 }
 0x2bb   : > { %1194 = vpow2.f32 %v608_v40 }
 0x2bc   : > { %1196 = vpow2.f32 %v602_v42 }
 0x2bd   : > { %v591_v43 = vpop.xlane.xlu1 %590 }
 0x2be   : > { %v599_v44 = vsub.f32 %v583_v30, %v591_v43 }
 0x2c0   : > { %v604_v45 = vmul.f32 1.442695, %v599_v44 }
 0x2c1   : > { %v1693_v46 = vpop.eup %1194 }
 0x2c2   : > { %1198 = vpow2.f32 %v604_v45  ;;  %v619_v47 = vsel %vm471_vm1, %v1693_v46, 0.0  ;;  %v1697_v48 = vpop.eup %1196 }
 0x2c3   : > { %620 = vadd.xlane.f32.xlu0 %v619_v47  ;;  %v610_v51 = vsel %vm471_vm1, %v1697_v48, 0.0  ;;  %v809_v47 = vld [vmem:[#allocation8 + $0x10] sm:$0xff] }
 0x2c8   : > { %v1699_v49 = vpop.eup %1198 }
 0x2c9   : > { %v613_v50 = vsel %vm471_vm1, %v1699_v49, 0.0 }
 0x2ca   : > { %614 = vadd.xlane.f32.xlu1 %v613_v50 }
 0x2cb   : > { %611 = vadd.xlane.f32.xlu0 %v610_v51 }
 0x2d2   : > { %1183 = vrot.lane.b32.xlu2 %v1182_v52, %s1452_s23 }
 0x2df   : > { %686 = vrot.lane.b32.xlu0 %v1663_v7, %s1452_s23 }
 0x2e3   : > { %712 = vrot.lane.b32.xlu1 %v1674_v10, %s1452_s23 }
 0x32d   : > { %v618_v53 = vpop.xlane.xlu2 %617 }
 0x32e   : > { %1200 = vrcp.f32 %v618_v53  ;;  %v661_v62 = vand.u32 2147483648, %v618_v53  ;;  %vm655_vm3 = vweird.f32 %v618_v53  ;;  %v659_v0 = vand.u32 2147483647, %v618_v53 }
 0x330   : > { %v662_v5 = vor.u32 1.1754944e-38, %v661_v62  ;;  %vm660_vm5 = vcmp.eq.f32.partialorder %v659_v0, 8.507059e+37  ;;  %v1456_v62 = vmov 32.0  }
 0x334   : > { %v1201_v54 = vpop.eup %1200 }
 0x335   : > { %v651_v55 = vmul.f32 %v1201_v54, %v618_v53  ;;  %v1184_v56 = vpop.permute.xlu2 %1183  ;;  %vm656_vm2 = vweird.f32 %v1201_v54 }
 0x336   : > { %v1186_v57 = vunpack.i.h.bf16 %v1184_v56  ;;  %v621_v58 = vpop.xlane.xlu0 %620  ;;  %v1185_v59 = vunpack.i.l.bf16 %v1184_v56  ;;  %vm657_vm4 = vmor %vm655_vm3, %vm656_vm2 }
 0x337   : > { %v652_v60 = vsub.f32 1.0, %v651_v55  ;;  %1202 = vrcp.f32 %v621_v58  ;;  %v675_v10 = vand.u32 2147483648, %v621_v58  ;;  %v673_v13 = vand.u32 2147483647, %v621_v58 }
 0x338   : > { %759 = vmatpush.msrb.mxu0 %v1185_v59  ;;  %785 = vmatpush.msra.mxu1 %v1186_v57  ;;  %vm669_vm7 = vweird.f32 %v621_v58  ;;  %v1189_v57 = vld [vmem:[%s1799_s5] ss:$0 sm:$0xff] }
 0x339   : > { %v653_v61 = vmul.f32 %v1201_v54, %v652_v60  ;;  %v676_v17 = vor.u32 1.1754944e-38, %v675_v10  ;;  %vm674_vm9 = vcmp.eq.f32.partialorder %v673_v13, 8.507059e+37 }
 0x33b   : > { %v654_v63 = vadd.f32 %v1201_v54, %v653_v61 }
 0x33d   : > { %v1203_v1 = vpop.eup %1202  ;;  %v615_v2 = vpop.xlane.xlu1 %614  ;;  %v658_v3 = vsel %vm657_vm4, %v1201_v54, %v654_v63  ;;  %vm803_vm4 = vcmask 130048  }
 0x33e   : > { %v665_v6 = vmul.f32 %v1203_v1, %v621_v58  ;;  %1204 = vrcp.f32 %v615_v2  ;;  %v612_v7 = vpop.xlane.xlu0 %611  ;;  %v663_v9 = vsel %vm660_vm5, %v662_v5, %v658_v3  ;;  %vm670_vm6 = vweird.f32 %v1203_v1 }
 0x33f   : > { %1206 = vrcp.f32 %v612_v7  ;;  %v680_v11 = vmul.f32 %v1193_v38, %v663_v9  ;;  %vm671_vm8 = vmor %vm669_vm7, %vm670_vm6  ;;  %v647_v23 = vand.u32 2147483648, %v615_v2  ;;  %v645_v27 = vand.u32 2147483647, %v615_v2 }
 0x340   : > { %v666_v8 = vsub.f32 1.0, %v665_v6  ;;  %v633_v28 = vand.u32 2147483648, %v612_v7  ;;  %v631_v30 = vand.u32 2147483647, %v612_v7  ;;  %vm641_vm12 = vweird.f32 %v615_v2 }
 0x341   : > { %684 = vst.msk [vmem:[%s1709_s14 + $0x10] sm:$0xff] %vm471_vm1, %v680_v11  ;;  %1082 = vmatmul.msk.f32.vlgmr.msrb.gmra.mxu0 %vm471_vm1, %v680_v11  ;;  %v648_v32 = vor.u32 1.1754944e-38, %v647_v23  ;;  %vm627_vm14 = vweird.f32 %v612_v7  ;;  %vm646_vm15 = vcmp.eq.f32.partialorder %v645_v27, 8.507059e+37  ;;  %vm805_vm5 = vcmask 195584  }
 0x342   : > { %v667_v12 = vmul.f32 %v1203_v1, %v666_v8  ;;  %v634_v34 = vor.u32 1.1754944e-38, %v633_v28  ;;  %vm632_vm3 = vcmp.eq.f32.partialorder %v631_v30, 8.507059e+37  ;;  %1208 = vrcp.f32 %v1456_v62 }
 0x344   : > { %v1205_v14 = vpop.eup %1204  ;;  %v668_v15 = vadd.f32 %v1203_v1, %v667_v12 }
 0x345   : > { %v1207_v16 = vpop.eup %1206  ;;  %v637_v18 = vmul.f32 %v1205_v14, %v615_v2  ;;  %vm642_vm10 = vweird.f32 %v1205_v14 }
 0x346   : > { %v672_v19 = vsel %vm671_vm8, %v1203_v1, %v668_v15  ;;  %v623_v20 = vmul.f32 %v1207_v16, %v612_v7  ;;  %vm628_vm11 = vweird.f32 %v1207_v16  ;;  %vm643_vm13 = vmor %vm641_vm12, %vm642_vm10 }
 0x347   : > { %v677_v21 = vsel %vm674_vm9, %v676_v17, %v672_v19  ;;  %v638_v22 = vsub.f32 1.0, %v637_v18  ;;  %vm629_vm2 = vmor %vm627_vm14, %vm628_vm11 }
 0x348   : > { %v624_v24 = vsub.f32 1.0, %v623_v20  ;;  %v681_v25 = vmul.f32 %v1693_v46, %v677_v21  ;;  %v810_v46 = vld [vmem:[#allocation8 + $0x18] sm:$0xff]  ;;  %v1209_v63 = vpop.eup %1208 }
 0x349   : > { %v639_v26 = vmul.f32 %v1205_v14, %v638_v22  ;;  %v843_v0 = vmul.f32 32.0, %v1209_v63 }
 0x34a   : > { %v625_v29 = vmul.f32 %v1207_v16, %v624_v24  ;;  %685 = vst.msk [vmem:[%s1709_s14 + $0x18] sm:$0xff] %vm471_vm1, %v681_v25  ;;  %1083 = vmatmul.msk.f32.vlgmr.msra.gmra.mxu1 %vm471_vm1, %v681_v25 }
 0x34b   : > { %v640_v31 = vadd.f32 %v1205_v14, %v639_v26  ;;  %v844_v1 = vsub.f32 1.0, %v843_v0 }
 0x34c   : > { %v626_v33 = vadd.f32 %v1207_v16, %v625_v29 }
 0x34d   : > { %v644_v35 = vsel %vm643_vm13, %v1205_v14, %v640_v31  ;;  %v845_v2 = vmul.f32 %v1209_v63, %v844_v1 }
 0x34e   : > { %v630_v36 = vsel %vm629_vm2, %v1207_v16, %v626_v33  ;;  %v649_v37 = vsel %vm646_vm15, %v648_v32, %v644_v35 }
 0x34f   : > { %v635_v38 = vsel %vm632_vm3, %v634_v34, %v630_v36  ;;  %v679_v39 = vmul.f32 %v1699_v49, %v649_v37  ;;  %v807_v49 = vld [vmem:[#allocation8] sm:$0xff]  ;;  %v846_v3 = vadd.f32 %v1209_v63, %v845_v2 }
 0x350   : > { %v678_v40 = vmul.f32 %v1697_v48, %v635_v38  ;;  %v808_v48 = vld [vmem:[#allocation8 + $0x8] sm:$0xff] }
 0x351   : > { %v687_v41 = vpop.permute.xlu0 %686  ;;  %683 = vst.msk [vmem:[%s1709_s14 + $0x8] sm:$0xff] %vm471_vm1, %v679_v39 }
 0x352   : > { %707 = vmatpush.msrb.mxu2 %v687_v41  ;;  %682 = vst.msk [vmem:[%s1709_s14] sm:$0xff] %vm471_vm1, %v678_v40 }
 0x353   : > { %1080 = vmatmul.msk.f32.vlgmr.msrb.gmra.mxu2 %vm471_vm1, %v678_v40 }
 0x354   : > { %830 = vmatpush.msra.mxu2 %v810_v46 }
 0x355   : > { %v713_v42 = vpop.permute.xlu1 %712 }
 0x356   : > { %733 = vmatpush.msrb.mxu3 %v713_v42  ;;  %831 = vmatpush.msra.mxu2 %v809_v47 }
 0x357   : > { %1081 = vmatmul.msk.f32.vlgmr.msrb.gmra.mxu3 %vm471_vm1, %v679_v39 }
 0x358   : > { %832 = vmatpush.msra.mxu2 %v808_v48 }
 0x35a   : > { %833 = vmatpush.msra.mxu2 %v807_v49 }
 0x3be   : > { %v761_v43 = vpop.f32.mrf.mxu0 }
 0x3bf   : > { %795 = vrot.lane.b32.xlu2 %v761_v43, %s1453_s29  ;;  %s1352_s29 = scalar_lea.hbm %s1803_s9, 64 }
 0x3c0   : > { %p1354_p9 = scmp.lt.s32.totalorder %s1352_s29, %s1348_s28 }
 0x3c2   : > { %p1355_p5 = por %p1354_p9, %p1353_p7 }
 0x3c4   : > { %p1356_p8 = pnand %p1355_p5, %p1351_p12 }
 0x3c7   : > { %v787_v45 = vpop.f32.mrf.mxu1 }
 0x3d6   : > { %v709_v51 = vpop.f32.mrf.mxu2 }
 0x3da   : > { %v735_v44 = vpop.f32.mrf.mxu3 }
 0x3db   : > { %791 = vrot.lane.b32.xlu1 %v735_v44, %s1454_s13 }
 0x3e3   : > { %799 = vrot.lane.b32.xlu1 %v787_v45, %s1455_s25 }
 0x419   : > { %v796_v53 = vpop.permute.xlu2 %795 }
 0x44d   : > { %v792_v50 = vpop.permute.xlu1 %791 }
 0x44e   : > { %v802_v52 = vsel %vm471_vm1, %v709_v51, %v792_v50  ;;  %vm847_vm1 = vweird.f32 %v1209_v63 }
 0x44f   : > { %v804_v55 = vsel %vm803_vm4, %v802_v52, %v796_v53  ;;  %v848_v5 = vsel %vm847_vm1, %v1209_v63, %v846_v3 }
 0x455   : > { %v800_v54 = vpop.permute.xlu1 %799 }
 0x456   : > { %v806_v56 = vsel %vm805_vm5, %v804_v55, %v800_v54 }
 0x457   : > { %1084 = vmatmul.msk.f32.vlgmr.msra.gmra.mxu2 %vm438_vm0, %v806_v56 }
 0x4da   : > { %v835_v58 = vpop.f32.mrf.mxu2 }
 0x4db   : > { %v836_v59 = vadd.f32 %v1189_v57, %v835_v58 }
 0x4dd   : > { %v838_v60 = vadd.f32 %v836_v59, %v1656_v4 }
 0x4df   : > { %v839_v61 = vsel %vm438_vm0, %v838_v60, 0.0 }
 0x4e0   : > { %840 = vadd.xlane.f32.xlu0 %v839_v61 }
 0x553   : > { %v841_v6 = vpop.xlane.xlu0 %840 }
 0x554   : > { %v849_v7 = vmul.f32 %v848_v5, %v841_v6 }
 0x556   : > { %v850_v8 = vsub.f32 %v838_v60, %v849_v7 }
 0x558   : > { %v851_v4 = vmul.f32 %v850_v8, %v850_v8 }
 0x55a   : > { %v852_v9 = vsel %vm438_vm0, %v851_v4, 0.0 }
 0x55b   : > { %853 = vadd.xlane.f32.xlu2 %v852_v9 }
 0x55c   : > { %1359 = shalt.err (!%p1356_p8)
}
 0x55d   : > { %s1457_s14 = smov 128   ;;  %s1087_s26 = sshll.u32 %s1532_s16, 3  ;;  %v1190_v19 = vld [vmem:[%s1800_s6] ss:$0 sm:$0xff] }
 0x55e   : > { %1106 = dma.vmem_to_hbm [thread:$0]  (%p1579_p4), %s912_s27, 512, %s914_s22, %s885_s18, %s1457_s14, %s1457_s14, %s1454_s13  }
 0x55f   : > { %s895_s15 = scalar_lea.hbm %s1802_s8, %s1087_s26  ;;  %v1191_v22 = vld [vmem:[%s1801_s7] ss:$0 sm:$0xff]  ;;  %s421_s16 = scalar_lea.vmem [#allocation10], %s1066_s19 }
 0x560   : > { %s897_s18 = sshll.u32 %s421_s16, 4  ;;  %s899_s11 = sshll.u32 %s895_s15, 4  ;;  %s898_s18 = int_to_ptr.vmem [resolvable:$true] %s897_s18  ;;  %s900_s11 = int_to_ptr.hbm [resolvable:$true] %s899_s11 }
 0x561   : > { %s880_s28 = scalar_lea.sflag [#allocation4], %s1632_s4  ;;  %s1374_s23 = sshra.s32 %s900_s11, 4  ;;  %s1375_s23 = int_to_ptr.hbm [resolvable:$true] %s1374_s23 }
 0x562   : > { %s1376_s24 = scalar_lea.hbm %s1375_s23, 8  ;;  %s1380_s19 = scalar_lea.hbm %s1802_s8, 16 }
 0x563   : > { %p1377_p10 = scmp.ne.s32.totalorder %s1375_s23, %s1376_s24  ;;  %p1381_p0 = scmp.lt.s32.totalorder %s1375_s23, %s1802_s8 }
 0x564   : > { %p1382_p2 = scmp.lt.s32.totalorder %s1380_s19, %s1376_s24 }
 0x565   : > { %p1378_p13 = pnand %p1377_p10, %p1579_p4 }
 0x566   : > { %p1383_p1 = por %p1382_p2, %p1381_p0 }
 0x567   : > { %p1379_p11 = pneg %p1378_p13 }
 0x569   : > { %p1384_p3 = pnand %p1383_p1, %p1379_p11 }
 0x5ce   : > { %v854_v10 = vpop.xlane.xlu2 %853 }
 0x5cf   : > { %v855_v11 = vmul.f32 %v854_v10, %v848_v5 }
 0x5d1   : > { %v856_v12 = vadd.f32 1e-12, %v855_v11 }
 0x5d3   : > { %1210 = vrsqrt.f32 %v856_v12  ;;  %vm863_vm7 = vweird.f32 %v856_v12 }
 0x5d9   : > { %v1211_v13 = vpop.eup %1210 }
 0x5da   : > { %v858_v14 = vmul.f32 %v1211_v13, %v856_v12  ;;  %vm864_vm6 = vweird.f32 %v1211_v13 }
 0x5db   : > { %vm865_vm8 = vmor %vm863_vm7, %vm864_vm6 }
 0x5dc   : > { %v859_v15 = vmul.f32 %v1211_v13, %v858_v14 }
 0x5de   : > { %v860_v16 = vmul.f32 0.5, %v859_v15 }
 0x5e0   : > { %v861_v17 = vsub.f32 1.5, %v860_v16 }
 0x5e2   : > { %v862_v18 = vmul.f32 %v1211_v13, %v861_v17 }
 0x5e4   : > { %v866_v20 = vsel %vm865_vm8, %v1211_v13, %v862_v18 }
 0x5e5   : > { %v867_v21 = vmul.f32 %v866_v20, %v850_v8 }
 0x5e7   : > { %v872_v23 = vmul.f32 %v1190_v19, %v867_v21 }
 0x5e9   : > { %v877_v24 = vadd.f32 %v1191_v22, %v872_v23 }
 0x5eb   : > { %878 = vst.msk [vmem:[%s421_s16] sm:$0xff] %vm438_vm0, %v877_v24 }
 0x5ec   : > { %1387 = shalt.err (!%p1384_p3)
}
 0x5ed   : > { %1105 = dma.vmem_to_hbm [thread:$0]  (%p1579_p4), %s898_s18, 128, %s900_s11, %s880_s28  }
 0x5ee PF: > { %s1824_s4 = sld [smem:[#allocation19_spill]]  ;;  %p1826_p12 = scmp.ge.s32.totalorder %s1442_s12, 2 }
 0x5f0   : > { %p1124_p7 = pnand %p1826_p12, %p1583_p6 }
 0x5f2   : > { %p1125_p9 = pneg %p1124_p7 }
 0x5f4   : > { %s928_s2 = sand.u32 1, %s1824_s4  }
 0x5f5   : > { %s929_s30 = scalar_lea.sflag [#allocation4], %s928_s2 }
 0x5f6   : > { %1421 = dma.done.wait (%p1125_p9), %s929_s30, 128  }
 0x5f7   : > { %1423 = vsyncadd (%p1125_p9), %s929_s30, 4294967168  ;;  %s939_s13 = scalar_lea.sflag [#allocation12], %s928_s2 }
 0x5f8   : > { %1425 = dma.done.wait (%p1125_p9), %s939_s13, 512  }
 0x5f9   : > { %1427 = vsyncadd (%p1125_p9), %s939_s13, 4294966784  ;;  %s1827_s12 = sld [smem:[#allocation21_spill]]  ;;  %s1830_s30 = smov %s1434_s10 }
 0x5fa   : > { %s1828_s17 = sld [smem:[#allocation20_spill]] }
 0x5fb   : > { %s1829_s11 = sld [smem:[#allocation22_spill]] }
 0x5ff   : > { %p30_p4 = scmp.ge.s32.totalorder %s1827_s12, 4  }
 0x600   : > { %s1831_s10 = smov %s1828_s17 }
 0x601   :  { %32 = sbr.rel (!%p30_p4) target bundleno = 13 (0xd), region = 135 }
 0x606   :  { %945 = vsyncpa [#allocation3], 1 }
 0x607   :  { %947 = vsyncpa [#allocation3 + $0x1], 1 }
 0x608   :  { %948 = vsyncpa [#allocation6], 1 }
 0x609   :  { %950 = vsyncpa [#allocation6 + $0x1], 1 }
 0x60a   :  { %951 = vsyncpa [#allocation9], 1 }
 0x60b   :  { %952 = vsyncpa [#allocation4], 1 }
 0x60c   :  { %954 = vsyncpa [#allocation4 + $0x1], 1 }
 0x60d   :  { %955 = vsyncpa [#allocation12], 1 }
 0x60e   :  { %957 = vsyncpa [#allocation12 + $0x1], 1 }

</bundles_post_ra>
